<compile_context>
chip_gen: v7x
topology: tpu7x:2x2x1
jax: 0.10.0
libtpu: 0.0.40
codegen_flags: <defaults>
</compile_context>

<pallas_src>
import jax
import jax.numpy as jnp
from jax.experimental import pallas as pl
from jax.experimental.pallas import tpu as pltpu


_LANE = 128  # TPU lane width


def _round_up(x, m):
    return ((x + m - 1) // m) * m


def _mlb_head_kernel(x_ref, w_emb_ref, b_emb_ref, w_pc_ref, b_pc_ref, out_ref):
    # One MXU dot computes BOTH modality embeddings (block-diagonal packed
    # weight on the concatenated [eeg | nirs] features).
    emb = jnp.tanh(
        jnp.dot(x_ref[...], w_emb_ref[...], preferred_element_type=jnp.float32)
        + b_emb_ref[...]
    )
    half = emb.shape[-1] // 2          # multiple of 128 -> tile-aligned split
    h = emb[:, :half] * emb[:, half:]  # MLB fusion: tanh(e) * tanh(n)
    # proj_joint and fc folded offline into a single (lane-padded) affine map.
    out_ref[...] = (
        jnp.dot(h, w_pc_ref[...], preferred_element_type=jnp.float32)
        + b_pc_ref[...]
    )


def pack_params(p):
    """Fold proj_joint+fc and pack both embedding layers lane-densely.

    Weights are stored as (in, out) == PyTorch weight.T.
    """
    eeg_dim, emb_dim = p["w_e"].shape
    nirs_dim = p["w_n"].shape[0]
    _, n_classes = p["w_fc"].shape

    e_pad = _round_up(emb_dim, _LANE)      # each embedding gets its own tile(s)
    c_pad = _round_up(n_classes, _LANE)    # lane-dense output slab

    # Block-diagonal merged embedding weight: [eeg | nirs] -> [e_pad | e_pad]
    w_emb = jnp.zeros((eeg_dim + nirs_dim, 2 * e_pad), jnp.float32)
    w_emb = w_emb.at[:eeg_dim, :emb_dim].set(p["w_e"])
    w_emb = w_emb.at[eeg_dim:, e_pad:e_pad + emb_dim].set(p["w_n"])
    b_emb = jnp.zeros((1, 2 * e_pad), jnp.float32)
    b_emb = b_emb.at[:, :emb_dim].set(p["b_e"])
    b_emb = b_emb.at[:, e_pad:e_pad + emb_dim].set(p["b_n"])
    # Padding lanes: tanh(0)*tanh(0) = 0 and their w_pc rows are 0 -> exact.

    # Fold the last two affine layers: (h @ w_p + b_p) @ w_fc + b_fc
    #                                == h @ (w_p @ w_fc) + (b_p @ w_fc + b_fc)
    w_fold = p["w_p"] @ p["w_fc"]              # (emb_dim, n_classes)
    b_fold = p["b_p"] @ p["w_fc"] + p["b_fc"]  # (1, n_classes)
    w_pc = jnp.zeros((e_pad, c_pad), jnp.float32).at[:emb_dim, :n_classes].set(w_fold)
    b_pc = jnp.zeros((1, c_pad), jnp.float32).at[:, :n_classes].set(b_fold)

    return {
        "w_emb": w_emb, "b_emb": b_emb,
        "w_pc": w_pc, "b_pc": b_pc,
        "n_classes": n_classes,
    }


def mlb_hybrid_head(eeg_feat, nirs_feat, packed, *, batch_tile=None):
    """Fused MLB + fc forward. eeg_feat: [B, eeg_dim], nirs_feat: [B, nirs_dim]."""
    x = jnp.concatenate([eeg_feat, nirs_feat], axis=-1).astype(jnp.float32)
    B, in_dim = x.shape
    w_emb, b_emb = packed["w_emb"], packed["b_emb"]
    w_pc, b_pc = packed["w_pc"], packed["b_pc"]
    n_classes = packed["n_classes"]
    emb2 = w_emb.shape[1]
    c_pad = w_pc.shape[1]
    out_shape = jax.ShapeDtypeStruct((B, c_pad), jnp.float32)

    if batch_tile is None or batch_tile >= B:
        # Whole problem is a single VMEM tile set: full-array VMEM specs, no grid.
        vmem = pl.BlockSpec(memory_space=pltpu.MemorySpace.VMEM)
        out_pad = pl.pallas_call(
            _mlb_head_kernel,
            out_shape=out_shape,
            in_specs=[vmem, vmem, vmem, vmem, vmem],
            out_specs=vmem,
        )(x, w_emb, b_emb, w_pc, b_pc)
    else:
        # Batch grid: block over B, weights resident (constant block index).
        # "parallel" lets the grid shard across both TensorCores on v7x.
        bt = batch_tile
        out_pad = pl.pallas_call(
            _mlb_head_kernel,
            out_shape=out_shape,
            grid=(pl.cdiv(B, bt),),
            in_specs=[
                pl.BlockSpec((bt, in_dim), lambda i: (i, 0)),
                pl.BlockSpec((in_dim, emb2), lambda i: (0, 0)),
                pl.BlockSpec((1, emb2), lambda i: (0, 0)),
                pl.BlockSpec((w_pc.shape[0], c_pad), lambda i: (0, 0)),
                pl.BlockSpec((1, c_pad), lambda i: (0, 0)),
            ],
            out_specs=pl.BlockSpec((bt, c_pad), lambda i: (i, 0)),
            compiler_params=pltpu.CompilerParams(
                dimension_semantics=("parallel",)),
        )(x, w_emb, b_emb, w_pc, b_pc)

    # Drop the lane padding (only the first n_classes columns are real).
    return out_pad[:, :n_classes]


def init_params(key, eeg_dim, nirs_dim, emb_dim, out_dim, n_classes=2):
    ks = jax.random.split(key, 8)
    scale = 0.1
    return {
        # stored as (in, out) == PyTorch weight.T
        "w_e":  scale * jax.random.normal(ks[0], (eeg_dim, emb_dim), jnp.float32),
        "b_e":  scale * jax.random.normal(ks[1], (1, emb_dim), jnp.float32),
        "w_n":  scale * jax.random.normal(ks[2], (nirs_dim, emb_dim), jnp.float32),
        "b_n":  scale * jax.random.normal(ks[3], (1, emb_dim), jnp.float32),
        "w_p":  scale * jax.random.normal(ks[4], (emb_dim, out_dim), jnp.float32),
        "b_p":  scale * jax.random.normal(ks[5], (1, out_dim), jnp.float32),
        "w_fc": scale * jax.random.normal(ks[6], (out_dim, n_classes), jnp.float32),
        "b_fc": scale * jax.random.normal(ks[7], (1, n_classes), jnp.float32),
    }


def reference_forward(eeg_feat, nirs_feat, p):
    """Pure-JAX reference mirroring the PyTorch MLB + fc forward (unfused)."""
    e = jnp.tanh(eeg_feat @ p["w_e"] + p["b_e"])
    n = jnp.tanh(nirs_feat @ p["w_n"] + p["b_n"])
    out = (e * n) @ p["w_p"] + p["b_p"]
    return out @ p["w_fc"] + p["b_fc"]


if __name__ == "__main__":
    # Module-consistent shapes: eeg_dim/nirs_dim/emb_dim/out_dim as in args_mlb.
    eeg_dim, nirs_dim, emb_dim, out_dim, n_classes = 32, 16, 32, 16, 2

    key = jax.random.PRNGKey(0)
    k_eeg, k_nirs, k_params, k_eeg2, k_nirs2 = jax.random.split(key, 5)

    params = init_params(k_params, eeg_dim, nirs_dim, emb_dim, out_dim, n_classes)
    packed = pack_params(params)

    # --- small batch: single VMEM tile, no grid -------------------------------
    B = 8
    eeg_feat = jax.random.normal(k_eeg, (B, eeg_dim), jnp.float32)
    nirs_feat = jax.random.normal(k_nirs, (B, nirs_dim), jnp.float32)

    out = jax.block_until_ready(mlb_hybrid_head(eeg_feat, nirs_feat, packed))
    ref = reference_forward(eeg_feat, nirs_feat, params)
    assert out.shape == (B, n_classes)
    assert jnp.allclose(out, ref, atol=1e-4, rtol=1e-4), "mismatch vs JAX reference"

    # --- larger batch: parallel batch grid (megacore sharding on v7x) ---------
    B2 = 256
    eeg2 = jax.random.normal(k_eeg2, (B2, eeg_dim), jnp.float32)
    nirs2 = jax.random.normal(k_nirs2, (B2, nirs_dim), jnp.float32)

    out2 = jax.block_until_ready(
        mlb_hybrid_head(eeg2, nirs2, packed, batch_tile=128))
    ref2 = reference_forward(eeg2, nirs2, params)
    assert out2.shape == (B2, n_classes)
    assert jnp.allclose(out2, ref2, atol=1e-4, rtol=1e-4), "mismatch (gridded path)"

    print("KERNEL_OK")
</pallas_src>

<mosaic_0001>
module attributes {stable_mosaic.version = 11 : i64} {
  func.func @_mlb_head_kernel(%arg0: memref<8x48xf32, #tpu.memory_space<vmem>>, %arg1: memref<48x256xf32, #tpu.memory_space<vmem>>, %arg2: memref<1x256xf32, #tpu.memory_space<vmem>>, %arg3: memref<128x128xf32, #tpu.memory_space<vmem>>, %arg4: memref<1x128xf32, #tpu.memory_space<vmem>>, %arg5: memref<8x128xf32, #tpu.memory_space<vmem>>) attributes {dimension_semantics = [], scalar_prefetch = 0 : i64, scratch_operands = 0 : i64, tpu.core_type = #tpu.core_type<tc>} {
    %c0 = arith.constant 0 : index
    %c0_0 = arith.constant 0 : index
    %0 = vector.load %arg0[%c0, %c0_0] : memref<8x48xf32, #tpu.memory_space<vmem>>, vector<8x48xf32>
    %c0_1 = arith.constant 0 : index
    %c0_2 = arith.constant 0 : index
    %1 = vector.load %arg1[%c0_1, %c0_2] : memref<48x256xf32, #tpu.memory_space<vmem>>, vector<48x256xf32>
    %cst = arith.constant dense<0.000000e+00> : vector<8x256xf32>
    %2 = tpu.matmul %0, %1, %cst {dimension_numbers = #tpu.dot_dimension_numbers<[1], [0], [0], [1], [0, 0, 1, 1], [], []>} : vector<8x48xf32>, vector<48x256xf32>, vector<8x256xf32> -> vector<8x256xf32>
    %c0_3 = arith.constant 0 : index
    %c0_4 = arith.constant 0 : index
    %3 = vector.load %arg2[%c0_3, %c0_4] : memref<1x256xf32, #tpu.memory_space<vmem>>, vector<1x256xf32>
    %4 = vector.broadcast %3 : vector<1x256xf32> to vector<8x256xf32>
    %5 = arith.addf %2, %4 : vector<8x256xf32>
    %6 = math.tanh %5 : vector<8x256xf32>
    %7 = vector.extract_strided_slice %6 {offsets = [0, 0], sizes = [8, 128], strides = [1, 1]} : vector<8x256xf32> to vector<8x128xf32>
    %8 = vector.extract_strided_slice %6 {offsets = [0, 128], sizes = [8, 128], strides = [1, 1]} : vector<8x256xf32> to vector<8x128xf32>
    %9 = arith.mulf %7, %8 : vector<8x128xf32>
    %c0_5 = arith.constant 0 : index
    %c0_6 = arith.constant 0 : index
    %10 = vector.load %arg3[%c0_5, %c0_6] : memref<128x128xf32, #tpu.memory_space<vmem>>, vector<128x128xf32>
    %cst_7 = arith.constant dense<0.000000e+00> : vector<8x128xf32>
    %11 = tpu.matmul %9, %10, %cst_7 {dimension_numbers = #tpu.dot_dimension_numbers<[1], [0], [0], [1], [0, 0, 1, 1], [], []>} : vector<8x128xf32>, vector<128x128xf32>, vector<8x128xf32> -> vector<8x128xf32>
    %c0_8 = arith.constant 0 : index
    %c0_9 = arith.constant 0 : index
    %12 = vector.load %arg4[%c0_8, %c0_9] : memref<1x128xf32, #tpu.memory_space<vmem>>, vector<1x128xf32>
    %13 = vector.broadcast %12 : vector<1x128xf32> to vector<8x128xf32>
    %14 = arith.addf %11, %13 : vector<8x128xf32>
    %c0_10 = arith.constant 0 : index
    %c0_11 = arith.constant 0 : index
    %15 = vector.load %arg5[%c0_10, %c0_11] : memref<8x128xf32, #tpu.memory_space<vmem>>, vector<8x128xf32>
    tpu.vector_store %arg5[%c0_10, %c0_11], %14 {strides = array<i32>} : memref<8x128xf32, #tpu.memory_space<vmem>>, vector<8x128xf32>,
    return
  }
}

</mosaic_0001>

<bundles_post_ra>
// kernel: tpu_custom_call.1
= control target key start
LH: loop header
LB: loop body
LE: loop exit
PB: predicated region body
PF: predicated region fallthrough
CT: control target
= control target key end

     0   :  { %10 = vsyncpa [#allocation3], 0  ;;  %s575_s0 = inlined_call_operand.hbm [shape: f32[8,48], index: 0, kind: input, shape index: {}]   ;;  %s576_s1 = inlined_call_operand.hbm [shape: f32[48,256], index: 1, kind: input, shape index: {}]   ;;  %s577_s2 = inlined_call_operand.vmem [shape: f32[1,256], index: 2, kind: input, shape index: {}]   ;;  %s578_s3 = inlined_call_operand.hbm [shape: f32[128,128], index: 3, kind: input, shape index: {}]   ;;  %s579_s4 = inlined_call_operand.vmem [shape: f32[1,128], index: 4, kind: input, shape index: {}]   ;;  %s580_s5 = inlined_call_operand.hbm [shape: f32[8,128], index: 5, kind: output, shape index: {}]  }
   0x1   :  { %11 = vsyncpa [#allocation6], 0 }
   0x2   :  { %12 = vsyncpa [#allocation4], 0  ;;  %s472_s18 = smov [#allocation5]   ;;  %s378_s22 = scalar_lea.hbm %s576_s1, 1536 }
   0x3   :  { %s28_s19 = sshll.u32 %s472_s18, 4  ;;  %p379_p0 = scmp.ne.s32.totalorder %s576_s1, %s378_s22  ;;  %s29_s19 = int_to_ptr.vmem [resolvable:$true] %s28_s19 }
   0x4   :  { %p382_p1 = scmp.lt.u32.totalorder %s378_s22, %s576_s1 }
   0x6   :  { %p384_p2 = pnand %p382_p1, %p379_p0 }
   0x8   :  { %387 = shalt.err (!%p384_p2)
}
   0x9   :  { %s388_s27 = scalar_lea.vmem %s29_s19, 1536  ;;  %p393_p4 = scmp.lt.s32.totalorder %s29_s19, %s29_s19 }
   0xa   :  { %p389_p3 = scmp.ne.s32.totalorder %s29_s19, %s388_s27  ;;  %p394_p5 = scmp.lt.s32.totalorder %s388_s27, %s388_s27 }
   0xc   :  { %p395_p6 = por %p394_p5, %p393_p4 }
   0xe   :  { %p396_p7 = pnand %p395_p6, %p389_p3 }
  0x10   :  { %399 = shalt.err (!%p396_p7)
}
  0x11   :  { %s473_s28 = smov 256   ;;  %s474_s29 = smov 16  }
  0x12   :  { %34 = dma.hbm_to_vmem [thread:$0]  %s576_s1, 1536, %s29_s19, [#allocation6], %s473_s28, %s473_s28, %s474_s29  }
  0x13   :  { %s475_s7 = smov [#allocation2]   ;;  %s476_s9 = smov [#allocation7]  }
  0x14   :  { %s19_s8 = sshll.u32 %s475_s7, 4  ;;  %s42_s10 = sshll.u32 %s476_s9, 4  ;;  %s20_s8 = int_to_ptr.vmem [resolvable:$true] %s19_s8  ;;  %s43_s10 = int_to_ptr.vmem [resolvable:$true] %s42_s10 }
  0x15   :  { %s400_s13 = scalar_lea.hbm %s575_s0, 128 }
  0x16   :  { %p401_p8 = scmp.ne.s32.totalorder %s575_s0, %s400_s13  ;;  %p404_p9 = scmp.lt.u32.totalorder %s400_s13, %s575_s0 }
  0x18   :  { %p406_p10 = pnand %p404_p9, %p401_p8 }
  0x1a   :  { %409 = shalt.err (!%p406_p10)
}
  0x1b   :  { %s410_s1 = scalar_lea.vmem %s20_s8, 128  ;;  %p415_p12 = scmp.lt.s32.totalorder %s20_s8, %s20_s8 }
  0x1c   :  { %p411_p11 = scmp.ne.s32.totalorder %s20_s8, %s410_s1  ;;  %p416_p13 = scmp.lt.s32.totalorder %s410_s1, %s410_s1 }
  0x1e   :  { %p417_p0 = por %p416_p13, %p415_p12 }
  0x20   :  { %p418_p1 = pnand %p417_p0, %p411_p11 }
  0x22   :  { %421 = shalt.err (!%p418_p1)
}
  0x23   :  { %22 = dma.hbm_to_vmem [thread:$0]  %s575_s0, 128, %s20_s8, [#allocation3]  }
  0x24   :  { %s422_s22 = scalar_lea.hbm %s578_s3, 2048 }
  0x25   :  { %p423_p2 = scmp.ne.s32.totalorder %s578_s3, %s422_s22  ;;  %p426_p3 = scmp.lt.u32.totalorder %s422_s22, %s578_s3 }
  0x27   :  { %p428_p4 = pnand %p426_p3, %p423_p2 }
  0x29   :  { %431 = shalt.err (!%p428_p4)
}
  0x2a   :  { %s432_s27 = scalar_lea.vmem %s43_s10, 2048  ;;  %p437_p6 = scmp.lt.s32.totalorder %s43_s10, %s43_s10 }
  0x2b   :  { %p433_p5 = scmp.ne.s32.totalorder %s43_s10, %s432_s27  ;;  %p438_p7 = scmp.lt.s32.totalorder %s432_s27, %s432_s27 }
  0x2d   :  { %p439_p8 = por %p438_p7, %p437_p6 }
  0x2f   :  { %p440_p9 = pnand %p439_p8, %p433_p5 }
  0x31   :  { %443 = shalt.err (!%p440_p9)
}
  0x32   :  { %s477_s0 = smov 128   ;;  %s478_s28 = smov 8  }
  0x33   :  { %48 = dma.hbm_to_vmem [thread:$0]  %s578_s3, 2048, %s43_s10, [#allocation6], %s477_s0, %s477_s0, %s478_s28  }
  0x34   :  { %466 = dma.done.wait [#allocation3], 128  }
  0x35   :  { %467 = vsyncadd [#allocation3], 4294967168 }
  0x36   :  { %468 = dma.done.wait [#allocation6], 3584  }
  0x37   :  { %469 = vsyncadd [#allocation6], 4294963712  ;;  %v479_v0 = vmov 0.0   ;;  %v480_v1 = vmov 0.0|0.0   ;;  %v62_v2 = vld [vmem:[#allocation5 + $0x8] sm:$0xff]  ;;  %v64_v3 = vld [vmem:[#allocation5 + $0x18] sm:$0xff]  ;;  %v75_v45 = vlaneseq }
  0x38   :  { %153 = vmatprep.mubr.f32.mxu0 %v479_v0  ;;  %339 = vmatprep.subr.bf16.mxu1 %v480_v1  ;;  %v61_v4 = vld [vmem:[#allocation5] sm:$0xff]  ;;  %v327_v5 = vpack.c.bf16 %v64_v3, %v62_v2  ;;  %v63_v6 = vld [vmem:[#allocation5 + $0x10] sm:$0xff]  ;;  %v66_v7 = vld [vmem:[#allocation5 + $0x28] sm:$0xff]  ;;  %vm85_vm0 = vcmask 392192   ;;  %vm481_vm1 = vmmov 0   ;;  %s482_s9 = smov [#allocation8]  }
  0x39   :  { %v68_v8 = vld [vmem:[#allocation5 + $0x38] sm:$0xff]  ;;  %v329_v9 = vpack.c.bf16 %v63_v6, %v61_v4  ;;  %v65_v11 = vld [vmem:[#allocation5 + $0x20] sm:$0xff]  ;;  %v67_v12 = vld [vmem:[#allocation5 + $0x30] sm:$0xff]  ;;  %324 = vmatprep.mubr.msk.f32.mxu1 %vm481_vm1, %v479_v0  ;;  %v76_v46 = vshrl.u32 %v75_v45, 7  ;;  %s263_s10 = sshll.u32 %s482_s9, 4  ;;  %s264_s10 = int_to_ptr.vmem [resolvable:$true] %s263_s10 }
  0x3a   :  { %v331_v10 = vpack.c.bf16 %v68_v8, %v66_v7  ;;  %v70_v13 = vld [vmem:[#allocation5 + $0x48] sm:$0xff]  ;;  %328 = vmatprep.subr.bf16.mxu0 %v327_v5  ;;  %v72_v14 = vld [vmem:[#allocation5 + $0x58] sm:$0xff]  ;;  %v333_v15 = vpack.c.bf16 %v67_v12, %v65_v11  ;;  %v69_v16 = vld [vmem:[#allocation5 + $0x40] sm:$0xff]  ;;  %p449_p11 = scmp.lt.s32.totalorder %s264_s10, %s264_s10 }
  0x3b   :  { %330 = vmatpush1.bf16.msra.mxu0 %v329_v9  ;;  %v163_v17 = vld [vmem:[#allocation7] sm:$0xff]  ;;  %v164_v18 = vld [vmem:[#allocation7 + $0x8] sm:$0xff]  ;;  %v335_v19 = vpack.c.bf16 %v72_v14, %v70_v13  ;;  %v71_v20 = vld [vmem:[#allocation5 + $0x50] sm:$0xff]  ;;  %v77_v47 = vsub.s32 0, %v76_v46  ;;  %v81_v49 = vsub.s32 1, %v76_v46 }
  0x3c   :  { %332 = vmatprep.subr.bf16.mxu0 %v331_v10  ;;  %v340_v21 = vpack.c.bf16 %v164_v18, %v163_v17  ;;  %v165_v22 = vld [vmem:[#allocation7 + $0x10] sm:$0xff]  ;;  %v166_v23 = vld [vmem:[#allocation7 + $0x18] sm:$0xff]  ;;  %v337_v25 = vpack.c.bf16 %v71_v20, %v69_v16  ;;  %v167_v26 = vld [vmem:[#allocation7 + $0x20] sm:$0xff] }
  0x3d   :  { %v343_v24 = vpack.c.bf16 %v166_v23, %v165_v22  ;;  %v168_v27 = vld [vmem:[#allocation7 + $0x28] sm:$0xff]  ;;  %v60_v29 = vld [vmem:[#allocation2] sm:$0xff]  ;;  %v169_v30 = vld [vmem:[#allocation7 + $0x30] sm:$0xff] }
  0x3e   :  { %341 = vmatpush3.bf16.msra.mxu1 %v340_v21  ;;  %v346_v28 = vpack.c.bf16 %v168_v27, %v167_v26  ;;  %v170_v31 = vld [vmem:[#allocation7 + $0x38] sm:$0xff]  ;;  %v171_v33 = vld [vmem:[#allocation7 + $0x40] sm:$0xff]  ;;  %v172_v34 = vld [vmem:[#allocation7 + $0x48] sm:$0xff] }
  0x3f   :  { %334 = vmatpush1.bf16.msra.mxu0 %v333_v15  ;;  %342 = vmatprep.subr.bf16.mxu1 %v480_v1  ;;  %v349_v32 = vpack.c.bf16 %v170_v31, %v169_v30  ;;  %v352_v35 = vpack.c.bf16 %v172_v34, %v171_v33  ;;  %v173_v36 = vld [vmem:[#allocation7 + $0x50] sm:$0xff]  ;;  %v174_v37 = vld [vmem:[#allocation7 + $0x58] sm:$0xff]  ;;  %v175_v39 = vld [vmem:[#allocation7 + $0x60] sm:$0xff] }
  0x40   :  { %336 = vmatprep.subr.bf16.mxu0 %v335_v19  ;;  %v355_v38 = vpack.c.bf16 %v174_v37, %v173_v36  ;;  %v176_v40 = vld [vmem:[#allocation7 + $0x68] sm:$0xff]  ;;  %v177_v42 = vld [vmem:[#allocation7 + $0x70] sm:$0xff]  ;;  %v178_v43 = vld [vmem:[#allocation7 + $0x78] sm:$0xff] }
  0x41   :  { %v358_v41 = vpack.c.bf16 %v176_v40, %v175_v39  ;;  %v361_v44 = vpack.c.bf16 %v178_v43, %v177_v42  ;;  %v73_v48 = vld [vmem:[%s577_s2] sm:$0x3]  ;;  %s444_s2 = scalar_lea.vmem %s264_s10, 128 }
  0x42   :  { %344 = vmatpush3.bf16.msra.mxu1 %v343_v24  ;;  %v78_v50 = vrot.slane %v73_v48, %v77_v47  ;;  %v82_v51 = vrot.slane %v73_v48, %v81_v49  ;;  %v274_v59 = vld [vmem:[%s579_s4] ss:$0 sm:$0xff]  ;;  %p445_p10 = scmp.ne.s32.totalorder %s264_s10, %s444_s2  ;;  %p450_p12 = scmp.lt.s32.totalorder %s444_s2, %s444_s2 }
  0x43   :  { %338 = vmatpush1.bf16.msra.mxu0 %v337_v25  ;;  %345 = vmatprep.subr.bf16.mxu1 %v480_v1 }
  0x44   :  { %p451_p13 = por %p450_p12, %p449_p11 }
  0x46   :  { %273 = vmatmul.mubr.msk.f32.vlgmr.msra.gmra.mrb[0].mxu0 %vm85_vm0, %v60_v29  ;;  %347 = vmatpush3.bf16.msra.mxu1 %v346_v28  ;;  %p452_p0 = pnand %p451_p13, %p445_p10 }
  0x47   :  { %348 = vmatprep.subr.bf16.mxu1 %v480_v1 }
  0x4a   :  { %350 = vmatpush3.bf16.msra.mxu1 %v349_v32 }
  0x4b   :  { %351 = vmatprep.subr.bf16.mxu1 %v480_v1 }
  0x4e   :  { %353 = vmatpush3.bf16.msra.mxu1 %v352_v35 }
  0x4f   :  { %354 = vmatprep.subr.bf16.mxu1 %v480_v1 }
  0x52   :  { %356 = vmatpush3.bf16.msra.mxu1 %v355_v38 }
  0x53   :  { %357 = vmatprep.subr.bf16.mxu1 %v480_v1 }
  0x56   :  { %359 = vmatpush3.bf16.msra.mxu1 %v358_v41 }
  0x57   :  { %360 = vmatprep.subr.bf16.mxu1 %v480_v1 }
  0x5a   :  { %362 = vmatpush3.bf16.msra.mxu1 %v361_v44 }
 0x119   :  { %v155_v52 = vpop.f32.mrb[0].mxu0 }
 0x11a   :  { %v156_v53 = vadd.f32 %v155_v52, %v78_v50  ;;  %v157_v54 = vpop.f32.mrb[1].mxu0 }
 0x11b   :  { %v158_v55 = vadd.f32 %v157_v54, %v82_v51 }
 0x11c   :  { %374 = vtanh.f32 %v156_v53 }
 0x11d   :  { %376 = vtanh.f32 %v158_v55 }
 0x126   :  { %v375_v56 = vpop.eup %374 }
 0x127   :  { %v377_v57 = vpop.eup %376 }
 0x128   :  { %v162_v58 = vmul.f32 %v377_v57, %v375_v56 }
 0x12a   :  { %325 = vmatmul.mubr.f32.vlgmr.msra.gmra.mrb[0].mxu1 %v162_v58 }
 0x1fd   :  { %v252_v60 = vpop.f32.mrb[0].mxu1 }
 0x1fe   :  { %v253_v61 = vadd.f32 %v274_v59, %v252_v60  ;;  %v326_v62 = vpop.f32.mrb[1].mxu1 }
 0x200   :  { %256 = vst [vmem:[#allocation8] sm:$0xff] %v253_v61 }
 0x201   :  { %455 = shalt.err (!%p452_p0)
}
 0x202   :  { %s456_s13 = scalar_lea.hbm %s580_s5, 128 }
 0x203   :  { %p457_p1 = scmp.ne.s32.totalorder %s580_s5, %s456_s13  ;;  %p460_p2 = scmp.lt.u32.totalorder %s456_s13, %s580_s5 }
 0x205   :  { %p462_p3 = pnand %p460_p2, %p457_p1 }
 0x207   :  { %465 = shalt.err (!%p462_p3)
}
 0x208   :  { %266 = dma.vmem_to_hbm [thread:$0]  %s264_s10, 128, %s580_s5, [#allocation4]  }
 0x209   :  { %470 = dma.done.wait [#allocation4], 128  }
 0x20a   :  { %471 = vsyncadd [#allocation4], 4294967168 }
 0x20b   :  { %270 = vsyncpa [#allocation3], 1 }
 0x20c   :  { %271 = vsyncpa [#allocation6], 1 }
 0x20d   :  { %272 = vsyncpa [#allocation4], 1 }

</bundles_post_ra>
